<compile_context>
chip_gen: v7x
topology: tpu7x:2x2x1
jax: 0.10.0
libtpu: 0.0.40
codegen_flags: <defaults>
</compile_context>

<pallas_src>
import functools

import jax
import jax.numpy as jnp
from jax import lax
from jax.experimental import pallas as pl
from jax.experimental.pallas import tpu as pltpu


def _round_up(x, m):
    return ((x + m - 1) // m) * m


def _log_sigmoid(x):
    # numerically-stable log(sigmoid(x)) = min(x, 0) - log1p(exp(-|x|))
    return jnp.minimum(x, 0.0) - jnp.log1p(jnp.exp(-jnp.abs(x)))


def _skipgram_kernel(ci_ref, co_ref, ns_ref,          # scalar-prefetch (SMEM) indices
                     cw_ref, xw_ref,                  # VMEM-resident embedding tables
                     out_ref,                         # (1, 8, 128) per-tile partial sum
                     v_scr, u_scr, nsum_scr,          # (tb, D) f32 scratch
                     *, batch_size, neg):
    i = pl.program_id(0)
    tb, d = v_scr.shape

    # ---- fused gather: table rows -> (tb, D) scratch, indices read from SMEM ----
    def gather_row(r, carry):
        g = i * tb + r                       # global row (padded rows gather row 0)
        c_idx = ci_ref[g]
        o_idx = co_ref[g]
        v_row = cw_ref[pl.ds(c_idx, 1), :].astype(jnp.float32)   # (1, D)
        u_row = xw_ref[pl.ds(o_idx, 1), :].astype(jnp.float32)   # (1, D)

        def neg_body(k, acc):
            nk = ns_ref[g * neg + k]
            return acc + xw_ref[pl.ds(nk, 1), :].astype(jnp.float32)

        nsum_row = lax.fori_loop(0, neg, neg_body,
                                 jnp.zeros((1, d), jnp.float32), unroll=True)

        v_scr[pl.ds(r, 1), :] = v_row
        u_scr[pl.ds(r, 1), :] = u_row
        nsum_scr[pl.ds(r, 1), :] = nsum_row
        return carry

    lax.fori_loop(0, tb, gather_row, 0)

    # ---- vectorized tile math (module semantics) ----
    #   pos_val = logsigmoid(sum_d v*u)
    #   neg_val = logsigmoid(-sum_n sum_d u_neg*v) == logsigmoid(-(sum_n u_neg).v)
    v = v_scr[...]
    u = u_scr[...]
    uneg_sum = nsum_scr[...]

    pos_score = jnp.sum(v * u, axis=1, keepdims=True)          # (tb, 1)
    neg_score = jnp.sum(uneg_sum * v, axis=1, keepdims=True)   # (tb, 1)
    row_loss = _log_sigmoid(pos_score) + _log_sigmoid(-neg_score)

    # Mask tail rows introduced by padding the batch up to a tile multiple.
    row = i * tb + lax.broadcasted_iota(jnp.int32, (tb, 1), 0)
    row_loss = jnp.where(row < batch_size, row_loss, 0.0)

    # One partial sum per grid step, written as a dense lane-aligned block.
    partial = jnp.sum(row_loss, axis=0, keepdims=True)          # (1, 1)
    out_ref[...] = jnp.zeros((1, 8, 128), jnp.float32) + partial.reshape(1, 1, 1)


def _pick_block_b(batch, emb_dim, vocab, itemsize):
    # Padding-aware VMEM estimate (lanes -> 128, sublanes -> 8).
    d_pad = _round_up(emb_dim, 128)
    v_pad = _round_up(vocab, 8)
    # Resident tables; conservatively assume the pipeline double-buffers them.
    table_bytes = 2 * 2 * v_pad * d_pad * itemsize
    # Per-TensorCore budget that is safe on v7x (64 MiB/TC) with headroom; v5e/v6e
    # (128 MiB VMEM) simply enjoy the raised 8192-row tile cap.
    budget = 40 * 1024 * 1024 - table_bytes
    per_row = 3 * d_pad * 4                  # v / u / neg-sum f32 scratch rows
    tb = max(8, min(budget // per_row, 8192))
    tb = (tb // 8) * 8
    b8 = _round_up(batch, 8)
    return int(max(8, min(tb, b8)))


@functools.partial(jax.jit, static_argnames=("block_b",))
def skipgram_forward(center_w, context_w, center_input, context_output,
                     negative_samples, *, block_b=None):
    batch = center_input.shape[0]
    vocab, emb_dim = center_w.shape
    neg = negative_samples.shape[1]
    itemsize = jnp.dtype(center_w.dtype).itemsize

    tb = block_b if block_b is not None else _pick_block_b(batch, emb_dim, vocab,
                                                           itemsize)
    tb = int(max(8, (min(int(tb), _round_up(batch, 8)) // 8) * 8))
    num_tiles = pl.cdiv(batch, tb)
    b_pad = num_tiles * tb

    # Only the (cheap) i32 index arrays are padded; padded rows gather row 0 and are
    # masked inside the kernel.
    ci = center_input.astype(jnp.int32)
    co = context_output.astype(jnp.int32)
    ns = negative_samples.astype(jnp.int32)
    if b_pad != batch:
        pad = b_pad - batch
        ci = jnp.pad(ci, (0, pad))
        co = jnp.pad(co, (0, pad))
        ns = jnp.pad(ns, ((0, pad), (0, 0)))
    ns_flat = ns.reshape(-1)   # 1-D SMEM layout (avoids 2-D SMEM padding blowup)

    kernel = functools.partial(_skipgram_kernel, batch_size=batch, neg=neg)

    cost = pl.CostEstimate(
        flops=int(b_pad) * int(emb_dim) * (int(neg) + 5),
        transcendentals=4 * int(b_pad),
        bytes_accessed=int(b_pad) * (int(neg) + 2) * 4
        + 2 * int(vocab) * int(emb_dim) * int(itemsize)
        + int(num_tiles) * 8 * 128 * 4,
    )

    partials = pl.pallas_call(
        kernel,
        out_shape=jax.ShapeDtypeStruct((num_tiles, 8, 128), jnp.float32),
        grid_spec=pltpu.PrefetchScalarGridSpec(
            num_scalar_prefetch=3,
            grid=(num_tiles,),
            in_specs=[
                # Whole tables, constant block index -> fetched once, VMEM-resident.
                pl.BlockSpec((vocab, emb_dim), lambda i, ci_r, co_r, ns_r: (0, 0)),
                pl.BlockSpec((vocab, emb_dim), lambda i, ci_r, co_r, ns_r: (0, 0)),
            ],
            out_specs=pl.BlockSpec((1, 8, 128),
                                   lambda i, ci_r, co_r, ns_r: (i, 0, 0)),
            scratch_shapes=[
                pltpu.VMEM((tb, emb_dim), jnp.float32),   # v
                pltpu.VMEM((tb, emb_dim), jnp.float32),   # u
                pltpu.VMEM((tb, emb_dim), jnp.float32),   # sum of negatives
            ],
        ),
        compiler_params=pltpu.CompilerParams(
            dimension_semantics=("parallel",),
            vmem_limit_bytes=48 * 1024 * 1024,
        ),
        cost_estimate=cost,
    )(ci, co, ns_flat, center_w, context_w)

    # Tiny epilogue: -sum over per-tile partial sums / batch.
    return -jnp.sum(partials[:, 0, 0]) / batch


def reference_forward(center_w, context_w, center_input, context_output,
                      negative_samples):
    # Pure-JAX f32 reference matching the PyTorch module exactly.
    v = jnp.take(center_w, center_input, axis=0)
    u = jnp.take(context_w, context_output, axis=0)
    pos_val = _log_sigmoid(jnp.sum(v * u, axis=1))
    u_neg = jnp.take(context_w, negative_samples, axis=0)
    neg_score = jnp.einsum("bnd,bd->bn", u_neg, v)
    neg_val = _log_sigmoid(-jnp.sum(neg_score, axis=1))
    return -jnp.mean(pos_val + neg_val)


if __name__ == "__main__":
    vocab_size = 50
    emb_dimension = 32
    batch = 8
    neg_size = 5

    key = jax.random.PRNGKey(0)
    k_center, k_context, k_ci, k_co, k_neg = jax.random.split(key, 5)

    initrange = 0.5 / emb_dimension
    # Module __init__: center ~ U(-initrange, initrange); context is zero-initialized.
    # Use a small non-zero context init so the loss is non-trivial (all-zeros would
    # make every term logsigmoid(0) = -log 2).
    center_w = jax.random.uniform(
        k_center, (vocab_size, emb_dimension), jnp.float32,
        minval=-initrange, maxval=initrange)
    context_w = jax.random.uniform(
        k_context, (vocab_size, emb_dimension), jnp.float32,
        minval=-initrange, maxval=initrange)

    center_input = jax.random.randint(k_ci, (batch,), 0, vocab_size, jnp.int32)
    context_output = jax.random.randint(k_co, (batch,), 0, vocab_size, jnp.int32)
    negative_samples = jax.random.randint(
        k_neg, (batch, neg_size), 0, vocab_size, jnp.int32)

    loss = skipgram_forward(center_w, context_w, center_input, context_output,
                            negative_samples)
    loss = jax.block_until_ready(loss)

    ref = reference_forward(center_w, context_w, center_input, context_output,
                            negative_samples)
    # f32 tables + f32 accumulation -> tight tolerance vs the f32 reference.
    assert jnp.allclose(loss, ref, atol=1e-5, rtol=1e-5), (loss, ref)

    print("KERNEL_OK")
</pallas_src>

<mosaic_0001>
module attributes {stable_mosaic.version = 11 : i64} {
  func.func @_skipgram_kernel(%arg0: i32, %arg1: memref<8xi32, #tpu.memory_space<smem>>, %arg2: memref<8xi32, #tpu.memory_space<smem>>, %arg3: memref<40xi32, #tpu.memory_space<smem>>, %arg4: memref<50x32xf32, #tpu.memory_space<vmem>>, %arg5: memref<50x32xf32, #tpu.memory_space<vmem>>, %arg6: memref<1x8x128xf32, #tpu.memory_space<vmem>>, %arg7: memref<8x32xf32, #tpu.memory_space<vmem>>, %arg8: memref<8x32xf32, #tpu.memory_space<vmem>>, %arg9: memref<8x32xf32, #tpu.memory_space<vmem>>) attributes {dimension_semantics = [#tpu.dimension_semantics<parallel>], iteration_bounds = array<i64: 1>, scalar_prefetch = 3 : i64, scratch_operands = 3 : i64, tpu.core_type = #tpu.core_type<tc>, window_params = [{pipeline_mode = #tpu.pipeline_mode<synchronous>, transform_indices = @transform_0, window_bounds = array<i64: 50, 32>}, {pipeline_mode = #tpu.pipeline_mode<synchronous>, transform_indices = @transform_1, window_bounds = array<i64: 50, 32>}, {transform_indices = @transform_2, window_bounds = array<i64: 1, 8, 128>}]} {
    %c0_i32 = arith.constant 0 : i32
    %c8_i32 = arith.constant 8 : i32
    %0 = arith.addi %c0_i32, %c8_i32 : i32
    %c1_i32 = arith.constant 1 : i32
    scf.for %arg10 = %c0_i32 to %0 step %c1_i32  : i32 {
      %c8_i32_20 = arith.constant 8 : i32
      %44 = arith.muli %arg0, %c8_i32_20 : i32
      %45 = arith.addi %44, %arg10 : i32
      %46 = arith.index_cast %45 : i32 to index
      %47 = memref.load %arg1[%46] : memref<8xi32, #tpu.memory_space<smem>>
      %48 = arith.index_cast %45 : i32 to index
      %49 = memref.load %arg2[%48] : memref<8xi32, #tpu.memory_space<smem>>
      %50 = arith.index_cast %47 : i32 to index
      %c0_21 = arith.constant 0 : index
      %51 = vector.load %arg4[%50, %c0_21] : memref<50x32xf32, #tpu.memory_space<vmem>>, vector<1x32xf32>
      %52 = arith.index_cast %49 : i32 to index
      %c0_22 = arith.constant 0 : index
      %53 = vector.load %arg5[%52, %c0_22] : memref<50x32xf32, #tpu.memory_space<vmem>>, vector<1x32xf32>
      %cst_23 = arith.constant 0.000000e+00 : f32
      %54 = vector.broadcast %cst_23 : f32 to vector<1x32xf32>
      %c0_i32_24 = arith.constant 0 : i32
      %c5_i32 = arith.constant 5 : i32
      %55 = arith.muli %45, %c5_i32 : i32
      %56 = arith.addi %55, %c0_i32_24 : i32
      %57 = arith.index_cast %56 : i32 to index
      %58 = memref.load %arg3[%57] : memref<40xi32, #tpu.memory_space<smem>>
      %59 = arith.index_cast %58 : i32 to index
      %c0_25 = arith.constant 0 : index
      %60 = vector.load %arg5[%59, %c0_25] : memref<50x32xf32, #tpu.memory_space<vmem>>, vector<1x32xf32>
      %61 = arith.addf %54, %60 : vector<1x32xf32>
      %c1_i32_26 = arith.constant 1 : i32
      %c5_i32_27 = arith.constant 5 : i32
      %62 = arith.muli %45, %c5_i32_27 : i32
      %63 = arith.addi %62, %c1_i32_26 : i32
      %64 = arith.index_cast %63 : i32 to index
      %65 = memref.load %arg3[%64] : memref<40xi32, #tpu.memory_space<smem>>
      %66 = arith.index_cast %65 : i32 to index
      %c0_28 = arith.constant 0 : index
      %67 = vector.load %arg5[%66, %c0_28] : memref<50x32xf32, #tpu.memory_space<vmem>>, vector<1x32xf32>
      %68 = arith.addf %61, %67 : vector<1x32xf32>
      %c2_i32 = arith.constant 2 : i32
      %c5_i32_29 = arith.constant 5 : i32
      %69 = arith.muli %45, %c5_i32_29 : i32
      %70 = arith.addi %69, %c2_i32 : i32
      %71 = arith.index_cast %70 : i32 to index
      %72 = memref.load %arg3[%71] : memref<40xi32, #tpu.memory_space<smem>>
      %73 = arith.index_cast %72 : i32 to index
      %c0_30 = arith.constant 0 : index
      %74 = vector.load %arg5[%73, %c0_30] : memref<50x32xf32, #tpu.memory_space<vmem>>, vector<1x32xf32>
      %75 = arith.addf %68, %74 : vector<1x32xf32>
      %c3_i32 = arith.constant 3 : i32
      %c5_i32_31 = arith.constant 5 : i32
      %76 = arith.muli %45, %c5_i32_31 : i32
      %77 = arith.addi %76, %c3_i32 : i32
      %78 = arith.index_cast %77 : i32 to index
      %79 = memref.load %arg3[%78] : memref<40xi32, #tpu.memory_space<smem>>
      %80 = arith.index_cast %79 : i32 to index
      %c0_32 = arith.constant 0 : index
      %81 = vector.load %arg5[%80, %c0_32] : memref<50x32xf32, #tpu.memory_space<vmem>>, vector<1x32xf32>
      %82 = arith.addf %75, %81 : vector<1x32xf32>
      %c4_i32 = arith.constant 4 : i32
      %c5_i32_33 = arith.constant 5 : i32
      %83 = arith.muli %45, %c5_i32_33 : i32
      %84 = arith.addi %83, %c4_i32 : i32
      %85 = arith.index_cast %84 : i32 to index
      %86 = memref.load %arg3[%85] : memref<40xi32, #tpu.memory_space<smem>>
      %87 = arith.index_cast %86 : i32 to index
      %c0_34 = arith.constant 0 : index
      %88 = vector.load %arg5[%87, %c0_34] : memref<50x32xf32, #tpu.memory_space<vmem>>, vector<1x32xf32>
      %89 = arith.addf %82, %88 : vector<1x32xf32>
      %c5_i32_35 = arith.constant 5 : i32
      %90 = arith.index_cast %arg10 : i32 to index
      %c0_36 = arith.constant 0 : index
      %91 = vector.load %arg7[%90, %c0_36] : memref<8x32xf32, #tpu.memory_space<vmem>>, vector<1x32xf32>
      tpu.vector_store %arg7[%90, %c0_36], %51 {strides = array<i32>} : memref<8x32xf32, #tpu.memory_space<vmem>>, vector<1x32xf32>,
      %92 = arith.index_cast %arg10 : i32 to index
      %c0_37 = arith.constant 0 : index
      %93 = vector.load %arg8[%92, %c0_37] : memref<8x32xf32, #tpu.memory_space<vmem>>, vector<1x32xf32>
      tpu.vector_store %arg8[%92, %c0_37], %53 {strides = array<i32>} : memref<8x32xf32, #tpu.memory_space<vmem>>, vector<1x32xf32>,
      %94 = arith.index_cast %arg10 : i32 to index
      %c0_38 = arith.constant 0 : index
      %95 = vector.load %arg9[%94, %c0_38] : memref<8x32xf32, #tpu.memory_space<vmem>>, vector<1x32xf32>
      tpu.vector_store %arg9[%94, %c0_38], %89 {strides = array<i32>} : memref<8x32xf32, #tpu.memory_space<vmem>>, vector<1x32xf32>,
    }
    %c8_i32_0 = arith.constant 8 : i32
    %c0 = arith.constant 0 : index
    %c0_1 = arith.constant 0 : index
    %1 = vector.load %arg7[%c0, %c0_1] : memref<8x32xf32, #tpu.memory_space<vmem>>, vector<8x32xf32>
    %c0_2 = arith.constant 0 : index
    %c0_3 = arith.constant 0 : index
    %2 = vector.load %arg8[%c0_2, %c0_3] : memref<8x32xf32, #tpu.memory_space<vmem>>, vector<8x32xf32>
    %c0_4 = arith.constant 0 : index
    %c0_5 = arith.constant 0 : index
    %3 = vector.load %arg9[%c0_4, %c0_5] : memref<8x32xf32, #tpu.memory_space<vmem>>, vector<8x32xf32>
    %4 = arith.mulf %1, %2 : vector<8x32xf32>
    %cst = arith.constant dense<0.000000e+00> : vector<8xf32>
    %5 = vector.multi_reduction <add>, %4, %cst [1] : vector<8x32xf32> to vector<8xf32>
    %6 = vector.shape_cast %5 : vector<8xf32> to vector<8x1xf32>
    %7 = arith.mulf %3, %1 : vector<8x32xf32>
    %cst_6 = arith.constant dense<0.000000e+00> : vector<8xf32>
    %8 = vector.multi_reduction <add>, %7, %cst_6 [1] : vector<8x32xf32> to vector<8xf32>
    %9 = vector.shape_cast %8 : vector<8xf32> to vector<8x1xf32>
    %cst_7 = arith.constant 0.000000e+00 : f32
    %10 = vector.broadcast %cst_7 : f32 to vector<8x1xf32>
    %11 = arith.minimumf %6, %10 : vector<8x1xf32>
    %12 = math.absf %6 : vector<8x1xf32>
    %cst_8 = arith.constant 0.000000e+00 : f32
    %13 = vector.broadcast %cst_8 : f32 to vector<8x1xf32>
    %14 = arith.subf %13, %12 : vector<8x1xf32>
    %15 = math.exp %14 : vector<8x1xf32>
    %16 = math.log1p %15 : vector<8x1xf32>
    %17 = arith.subf %11, %16 : vector<8x1xf32>
    %cst_9 = arith.constant 0.000000e+00 : f32
    %18 = vector.broadcast %cst_9 : f32 to vector<8x1xf32>
    %19 = arith.subf %18, %9 : vector<8x1xf32>
    %cst_10 = arith.constant 0.000000e+00 : f32
    %20 = vector.broadcast %cst_10 : f32 to vector<8x1xf32>
    %21 = arith.minimumf %19, %20 : vector<8x1xf32>
    %22 = math.absf %19 : vector<8x1xf32>
    %cst_11 = arith.constant 0.000000e+00 : f32
    %23 = vector.broadcast %cst_11 : f32 to vector<8x1xf32>
    %24 = arith.subf %23, %22 : vector<8x1xf32>
    %25 = math.exp %24 : vector<8x1xf32>
    %26 = math.log1p %25 : vector<8x1xf32>
    %27 = arith.subf %21, %26 : vector<8x1xf32>
    %28 = arith.addf %17, %27 : vector<8x1xf32>
    %c8_i32_12 = arith.constant 8 : i32
    %29 = arith.muli %arg0, %c8_i32_12 : i32
    %30 = tpu.iota {dimensions = array<i32: 0>} : vector<8x1xi32>
    %31 = vector.broadcast %29 : i32 to vector<8x1xi32>
    %32 = arith.addi %31, %30 : vector<8x1xi32>
    %c8_i32_13 = arith.constant 8 : i32
    %33 = vector.broadcast %c8_i32_13 : i32 to vector<8x1xi32>
    %34 = arith.cmpi slt, %32, %33 : vector<8x1xi32>
    %cst_14 = arith.constant 0.000000e+00 : f32
    %35 = vector.broadcast %cst_14 : f32 to vector<8x1xf32>
    %36 = arith.select %34, %28, %35 : vector<8x1xi1>, vector<8x1xf32>
    %cst_15 = arith.constant dense<0.000000e+00> : vector<1xf32>
    %37 = vector.multi_reduction <add>, %36, %cst_15 [0] : vector<8x1xf32> to vector<1xf32>
    %38 = vector.shape_cast %37 : vector<1xf32> to vector<1x1xf32>
    %cst_16 = arith.constant 0.000000e+00 : f32
    %39 = vector.broadcast %cst_16 : f32 to vector<1x8x128xf32>
    %40 = vector.shape_cast %38 : vector<1x1xf32> to vector<1x1x1xf32>
    %41 = vector.broadcast %40 : vector<1x1x1xf32> to vector<1x8x128xf32>
    %42 = arith.addf %39, %41 : vector<1x8x128xf32>
    %c0_17 = arith.constant 0 : index
    %c0_18 = arith.constant 0 : index
    %c0_19 = arith.constant 0 : index
    %43 = vector.load %arg6[%c0_17, %c0_18, %c0_19] : memref<1x8x128xf32, #tpu.memory_space<vmem>>, vector<1x8x128xf32>
    tpu.vector_store %arg6[%c0_17, %c0_18, %c0_19], %42 {strides = array<i32>} : memref<1x8x128xf32, #tpu.memory_space<vmem>>, vector<1x8x128xf32>,
    return
  }
  func.func @transform_0(%arg0: i32, %arg1: memref<8xi32, #tpu.memory_space<smem>>, %arg2: memref<8xi32, #tpu.memory_space<smem>>, %arg3: memref<40xi32, #tpu.memory_space<smem>>) -> (i32, i32) {
    %c0_i32 = arith.constant 0 : i32
    %c0_i32_0 = arith.constant 0 : i32
    %c0_i32_1 = arith.constant 0 : i32
    return %c0_i32, %c0_i32_0 : i32, i32
  }
  func.func @transform_1(%arg0: i32, %arg1: memref<8xi32, #tpu.memory_space<smem>>, %arg2: memref<8xi32, #tpu.memory_space<smem>>, %arg3: memref<40xi32, #tpu.memory_space<smem>>) -> (i32, i32) {
    %c0_i32 = arith.constant 0 : i32
    %c0_i32_0 = arith.constant 0 : i32
    %c0_i32_1 = arith.constant 0 : i32
    return %c0_i32, %c0_i32_0 : i32, i32
  }
  func.func @transform_2(%arg0: i32, %arg1: memref<8xi32, #tpu.memory_space<smem>>, %arg2: memref<8xi32, #tpu.memory_space<smem>>, %arg3: memref<40xi32, #tpu.memory_space<smem>>) -> (i32, i32, i32) {
    %c0_i32 = arith.constant 0 : i32
    %c0_i32_0 = arith.constant 0 : i32
    %c0_i32_1 = arith.constant 0 : i32
    return %arg0, %c0_i32, %c0_i32_0 : i32, i32, i32
  }
}

</mosaic_0001>

<bundles_post_ra>
// kernel: skipgram_forward.1
= control target key start
LH: loop header
LB: loop body
LE: loop exit
PB: predicated region body
PF: predicated region fallthrough
CT: control target
= control target key end

     0   :  { %s300_s0 = inlined_call_operand.vmem [shape: s32[8], index: 0, kind: input, shape index: {}]   ;;  %s301_s3 = inlined_call_operand.vmem [shape: f32[50,32], index: 3, kind: input, shape index: {}]   ;;  %s302_s4 = inlined_call_operand.vmem [shape: f32[50,32], index: 4, kind: input, shape index: {}]   ;;  %s303_s5 = inlined_call_operand.vmem [shape: f32[1,8,128], index: 5, kind: output, shape index: {}]   ;;  %s304_s1 = inlined_call_operand.vmem [shape: s32[8], index: 1, kind: input, shape index: {}]   ;;  %s305_s2 = inlined_call_operand.vmem [shape: s32[40], index: 2, kind: input, shape index: {}]  }
   0x1   :  { %s10_s20 = sshll.u32 %s300_s0, 4  ;;  %s14_s23 = sshll.u32 %s304_s1, 4  ;;  %s11_s20 = int_to_ptr.vmem [resolvable:$true] %s10_s20  ;;  %s15_s23 = int_to_ptr.vmem [resolvable:$true] %s14_s23 }
   0x2   :  { %s171_s24 = scalar_lea.vmem %s11_s20, 16  ;;  %p176_p1 = scmp.lt.s32.totalorder %s11_s20, %s11_s20 }
   0x3   :  { %p172_p0 = scmp.ne.s32.totalorder %s11_s20, %s171_s24  ;;  %p177_p2 = scmp.lt.s32.totalorder %s171_s24, %s171_s24 }
   0x5   :  { %p178_p3 = por %p177_p2, %p176_p1 }
   0x7   :  { %p179_p4 = pnand %p178_p3, %p172_p0 }
   0x9   :  { %182 = shalt.err (!%p179_p4)  }
   0xa   :  { %s217_s25 = smov [#allocation6]   ;;  %s183_s26 = scalar_lea.vmem %s15_s23, 16 }
   0xb   :  { %13 = dma.vmem_to_smem %s11_s20, 16, %s217_s25, [#allocation5] }
   0xc   :  { %p184_p5 = scmp.ne.s32.totalorder %s15_s23, %s183_s26  ;;  %p188_p6 = scmp.lt.s32.totalorder %s15_s23, %s15_s23 }
   0xd   :  { %p189_p7 = scmp.lt.s32.totalorder %s183_s26, %s183_s26 }
   0xf   :  { %p190_p8 = por %p189_p7, %p188_p6 }
  0x11   :  { %p191_p9 = pnand %p190_p8, %p184_p5 }
  0x13   :  { %194 = shalt.err (!%p191_p9)  }
  0x14   :  { %s218_s0 = smov [#allocation7]   ;;  %s18_s28 = sshll.u32 %s305_s2, 4  ;;  %s19_s28 = int_to_ptr.vmem [resolvable:$true] %s18_s28 }
  0x15   :  { %17 = dma.vmem_to_smem %s15_s23, 16, %s218_s0, [#allocation5] }
  0x16   :  { %s195_s29 = scalar_lea.vmem %s19_s28, 16  ;;  %p200_p11 = scmp.lt.s32.totalorder %s19_s28, %s19_s28 }
  0x17   :  { %p196_p10 = scmp.ne.s32.totalorder %s19_s28, %s195_s29  ;;  %p201_p12 = scmp.lt.s32.totalorder %s195_s29, %s195_s29 }
  0x19   :  { %p202_p13 = por %p201_p12, %p200_p11 }
  0x1b   :  { %p203_p0 = pnand %p202_p13, %p196_p10 }
  0x1d   :  { %206 = shalt.err (!%p203_p0)  }
  0x1e   :  { %s219_s30 = smov [#allocation8]  }
  0x1f   :  { %21 = dma.vmem_to_smem %s19_s28, 16, %s219_s30, [#allocation5] }
  0x20   :  { %211 = dma.done.wait [#allocation5], 48 }
  0x21   :  { %212 = vsyncadd [#allocation5], 4294967248 }
  0x22   :  { %23 = sfence }
  0x23   :  { %s259_s6 = smov 0  }
  0x24 LB: > { %s36_s2 = sld [smem:[#allocation6 + %s215_s6]]  ;;  %s42_s8 = smul.u32 5, %s215_s6  ;;  %vm68_vm0 = vcmask 253952   ;;  %s215_s6 = sphi %s259_s6, %s33_s6  }
  0x25   : > { %s37_s7 = sld [smem:[#allocation7 + %s215_s6]]  ;;  %s67_s21 = scalar_lea.vmem [#allocation2], %s215_s6 }
  0x26   : > { %s43_s9 = sld [smem:[#allocation8 + %s42_s8]]  ;;  %s47_s10 = sadd.s32 1, %s42_s8 }
  0x27   : > { %s48_s11 = sld [smem:[#allocation8 + %s47_s10]]  ;;  %s52_s12 = sadd.s32 2, %s42_s8 }
  0x28   : > { %s53_s16 = sld [smem:[#allocation8 + %s52_s12]]  ;;  %s57_s20 = sadd.s32 3, %s42_s8 }
  0x29   : > { %s58_s22 = sld [smem:[#allocation8 + %s57_s20]]  ;;  %s62_s23 = sadd.s32 4, %s42_s8 }
  0x2a   : > { %s38_s15 = scalar_lea.vmem %s301_s3, %s36_s2  ;;  %s70_s24 = scalar_lea.vmem [#allocation3], %s215_s6 }
  0x2b   : > { %v39_v0 = vld [vmem:[%s38_s15] sm:$0x1]  ;;  %s40_s19 = scalar_lea.vmem %s302_s4, %s37_s7  ;;  %s63_s25 = sld [smem:[#allocation8 + %s62_s23]] }
  0x2c   : > { %69 = vst.msk [vmem:[%s67_s21] sm:$0x1] %vm68_vm0, %v39_v0  ;;  %v41_v1 = vld [vmem:[%s40_s19] sm:$0x1]  ;;  %s44_s1 = scalar_lea.vmem %s302_s4, %s43_s9 }
  0x2d   : > { %71 = vst.msk [vmem:[%s70_s24] sm:$0x1] %vm68_vm0, %v41_v1  ;;  %v45_v2 = vld [vmem:[%s44_s1] sm:$0x1]  ;;  %s49_s29 = scalar_lea.vmem %s302_s4, %s48_s11  ;;  %s72_s11 = scalar_lea.vmem [#allocation4], %s215_s6 }
  0x2e   : > { %v50_v3 = vld [vmem:[%s49_s29] sm:$0x1]  ;;  %s54_s7 = scalar_lea.vmem %s302_s4, %s53_s16  ;;  %s33_s6 = sadd.s32 1, %s215_s6  }
  0x2f   : > { %v51_v4 = vadd.f32 %v50_v3, %v45_v2  ;;  %v55_v5 = vld [vmem:[%s54_s7] sm:$0x1]  ;;  %s59_s12 = scalar_lea.vmem %s302_s4, %s58_s22  ;;  %p30_p1 = scmp.ge.s32.totalorder %s33_s6, 8  }
  0x30   : > { %v60_v7 = vld [vmem:[%s59_s12] sm:$0x1]  ;;  %vm78_vm1 = vcmask (%p30_p1), 261120  }
  0x31   : > { %v56_v6 = vadd.f32 %v55_v5, %v51_v4  ;;  %s64_s14 = scalar_lea.vmem %s302_s4, %s63_s25  ;;  %32 = sbr.rel (!%p30_p1) target bundleno = 36 (0x24), region = 45 }
  0x32   : > { %v65_v8 = vld [vmem:[%s64_s14] sm:$0x1] }
  0x33   : > { %v61_v9 = vadd.f32 %v60_v7, %v56_v6  ;;  %v74_v11 = vld [vmem:[#allocation2] sm:$0xff] (%p30_p1) }
  0x34   :  { %v75_v13 = vld [vmem:[#allocation3] sm:$0xff] (%p30_p1) }
  0x35   : > { %v66_v10 = vadd.f32 %v65_v8, %v61_v9  ;;  %v77_v15 = vmul.f32 (%p30_p1), %v75_v13, %v74_v11 }
  0x37   : > { %73 = vst.msk [vmem:[%s72_s11] sm:$0x1] %vm68_vm0, %v66_v10  ;;  %v79_v17 = vsel (%p30_p1), %vm78_vm1, %v77_v15, 0.0 }
  0x3e   :  { %v76_v12 = vld [vmem:[#allocation4] sm:$0xff] }
  0x3f   :  { %v82_v14 = vmul.f32 %v76_v12, %v74_v11 }
  0x41   :  { %v83_v16 = vsel %vm78_vm1, %v82_v14, 0.0 }
  0x42   :  { %84 = vadd.xlane.f32.xlu0 %v83_v16 }
  0x46   :  { %80 = vadd.xlane.f32.xlu0 %v79_v17 }
  0xcf   :  { %v85_v18 = vpop.xlane.xlu0 %84 }
  0xd0   :  { %v101_v19 = vsub.f32 0.0, %v85_v18 }
  0xd2   :  { %v103_v20 = vand.u32 2147483647, %v101_v19  ;;  %v102_v44 = vmin.f32 %v101_v19, 0.0 }
  0xd3   :  { %v81_v21 = vpop.xlane.xlu0 %80 }
  0xd4   :  { %v104_v22 = vsub.f32 0.0, %v103_v20  ;;  %v87_v23 = vand.u32 2147483647, %v81_v21  ;;  %v86_v45 = vmin.f32 %v81_v21, 0.0 }
  0xd6   :  { %v105_v24 = vmul.f32 1.442695, %v104_v22  ;;  %v88_v25 = vsub.f32 0.0, %v87_v23 }
  0xd8   :  { %163 = vpow2.f32 %v105_v24  ;;  %v89_v26 = vmul.f32 1.442695, %v88_v25 }
  0xda   :  { %165 = vpow2.f32 %v89_v26 }
  0xe2   :  { %v164_v27 = vpop.eup %163 }
  0xe3   :  { %v107_v28 = vadd.f32 1.0, %v164_v27  ;;  %v110_v31 = vmul.f32 -0.5, %v164_v27  ;;  %v113_v34 = vand.u32 2147483647, %v164_v27 }
  0xe4   :  { %v166_v29 = vpop.eup %165 }
  0xe5   :  { %167 = vlog2.f32 %v107_v28  ;;  %v91_v30 = vadd.f32 1.0, %v166_v29  ;;  %v94_v32 = vmul.f32 -0.5, %v166_v29  ;;  %v111_v33 = vadd.f32 1.0, %v110_v31 }
  0xe6   :  { %v97_v37 = vand.u32 2147483647, %v166_v29  ;;  %vm114_vm2 = vcmp.lt.f32.partialorder %v113_v34, 0.0004427343 }
  0xe7   :  { %169 = vlog2.f32 %v91_v30  ;;  %v95_v35 = vadd.f32 1.0, %v94_v32  ;;  %v112_v39 = vmul.f32 %v164_v27, %v111_v33 }
  0xe8   :  { %vm98_vm3 = vcmp.lt.f32.partialorder %v97_v37, 0.0004427343 }
  0xe9   :  { %v96_v43 = vmul.f32 %v166_v29, %v95_v35 }
  0xef   :  { %v168_v36 = vpop.eup %167 }
  0xf0   :  { %v109_v38 = vmul.f32 0.6931472, %v168_v36 }
  0xf1   :  { %v170_v40 = vpop.eup %169 }
  0xf2   :  { %v115_v41 = vsel %vm114_vm2, %v112_v39, %v109_v38  ;;  %v93_v42 = vmul.f32 0.6931472, %v170_v40 }
  0xf3   :  { %v116_v47 = vsub.f32 %v102_v44, %v115_v41 }
  0xf4   :  { %v99_v46 = vsel %vm98_vm3, %v96_v43, %v93_v42 }
  0xf5   :  { %v100_v48 = vsub.f32 %v86_v45, %v99_v46 }
  0xf7   :  { %v117_v49 = vadd.f32 %v116_v47, %v100_v48 }
  0xf9   :  { %v125_v50 = vrot.slane %v117_v49, 4 }
  0xfb   :  { %v126_v51 = vadd.f32 %v125_v50, %v117_v49 }
  0xfd   :  { %v127_v52 = vrot.slane %v126_v51, 2 }
  0xff   :  { %v128_v53 = vadd.f32 %v127_v52, %v126_v51 }
 0x101   :  { %v129_v54 = vrot.slane %v128_v53, 1 }
 0x103   :  { %v130_v55 = vadd.f32 %v129_v54, %v128_v53 }
 0x105   :  { %132 = vst [vmem:[%s303_s5] sm:$0xff] %v130_v55 }

</bundles_post_ra>
